<compile_context>
chip_gen: v6e
topology: v6e:2x2x1
jax: 0.10.0
libtpu: 0.0.40
codegen_flags: <defaults>
</compile_context>

<pallas_src>
import math

import jax
import jax.numpy as jnp
import numpy as np
from jax.experimental import pallas as pl
from jax.experimental.pallas import tpu as pltpu

# --- Lambda.__init__ constants (deterministic, from the module source) --------
K_PD, K_VCO = 1.0, 1.0
TAU_P, TAU_Z1, TAU_Z2 = 0.9, 0.4, 0.4
OMEGA, K_F = 2.0, 1.01
COEFF = (TAU_Z1 - TAU_P) * (TAU_P - TAU_Z2) / TAU_P ** 2
COEFF_2 = TAU_Z1 * TAU_Z2 / TAU_P * K_PD

TILE_B = 8    # states per grid step (f32 min sublane tile)
LANES = 128   # vreg lane width; lanes 0..2 carry [s, v, d]


def lambda_kernel(y0_ref, y1_ref, y2_ref, o_ref):
    """RHS for TILE_B independent states, one state per sublane.

    y*_ref: VMEM (TILE_B, 1) f32 state columns.
    o_ref:  VMEM (TILE_B, LANES) f32; lanes 0..2 = [s, v, d], rest zero.
    """
    y0 = y0_ref[...]
    y1 = y1_ref[...]
    y2 = y2_ref[...]

    sin2 = jnp.sin(y2)  # one EUP vector sin covers all TILE_B states

    s = jnp.float32(K_PD) * sin2
    v = jnp.float32(-1.0 / TAU_P) * y1 + jnp.float32(COEFF * K_PD) * sin2
    d = (jnp.float32(OMEGA)
         - jnp.float32(K_F * K_VCO) * (y0 + y1 + jnp.float32(COEFF_2) * sin2))

    # Lane placement via in-kernel iota + selects (no constant DMA).
    lane = jax.lax.broadcasted_iota(jnp.int32, (TILE_B, LANES), 1)
    o_ref[...] = jnp.where(lane == 0, s,
                 jnp.where(lane == 1, v,
                 jnp.where(lane == 2, d, jnp.float32(0.0))))


def _rhs_padded(y_pad):
    """y_pad: (B_pad, 3) f32 with B_pad % TILE_B == 0 -> (B_pad, LANES) f32."""
    b_pad = y_pad.shape[0]
    y0 = y_pad[:, 0:1]
    y1 = y_pad[:, 1:2]
    y2 = y_pad[:, 2:3]
    col_spec = pl.BlockSpec((TILE_B, 1), lambda i: (i, 0))
    return pl.pallas_call(
        lambda_kernel,
        out_shape=jax.ShapeDtypeStruct((b_pad, LANES), jnp.float32),
        grid_spec=pltpu.PrefetchScalarGridSpec(
            num_scalar_prefetch=0,
            grid=(b_pad // TILE_B,),
            in_specs=[col_spec, col_spec, col_spec],
            out_specs=pl.BlockSpec((TILE_B, LANES), lambda i: (i, 0)),
        ),
        # Batch axis is embarrassingly parallel -> v7x's 2 TCs split it.
        compiler_params=pltpu.CompilerParams(
            dimension_semantics=("parallel",)),
    )(y0, y1, y2)


@jax.jit
def lambda_rhs_batched(y):
    """Batched RHS: y (B, 3) f32 -> (B, 3) f32, B states across sublanes."""
    y = jnp.asarray(y, jnp.float32).reshape(-1, 3)
    b = y.shape[0]
    b_pad = ((b + TILE_B - 1) // TILE_B) * TILE_B
    y_pad = jnp.pad(y, ((0, b_pad - b), (0, 0)))
    out_pad = _rhs_padded(y_pad)
    return out_pad[:b, 0:3]


@jax.jit
def lambda_forward(t, y):
    """Matches Lambda.forward(t, y): y is (1, 3) f32 -> (1, 3) f32."""
    del t  # the ODE RHS ignores t; kept for signature parity with PyTorch
    return lambda_rhs_batched(y).reshape(1, 3)


def _ref_rhs(yn):
    """Pure-numpy reference mirroring the PyTorch misha_3d."""
    sy = np.sin(yn[:, 2])
    s = K_PD * sy
    v = -1.0 / TAU_P * yn[:, 1] + COEFF * K_PD * sy
    d = OMEGA - K_F * K_VCO * (yn[:, 0] + yn[:, 1] + COEFF_2 * sy)
    return np.stack([s, v, d], axis=1).astype(np.float32)


if __name__ == "__main__":
    key = jax.random.PRNGKey(0)
    t0 = jnp.float32(0.0)  # e.g. first element of torch.linspace(0, 55, data_size)

    # Module-parity call: single (1, 3) state.
    y_single = jax.random.normal(key, (1, 3), jnp.float32)
    out_single = jax.block_until_ready(lambda_forward(t0, y_single))
    assert out_single.shape == (1, 3) and out_single.dtype == jnp.float32
    np.testing.assert_allclose(
        np.asarray(out_single),
        _ref_rhs(np.asarray(y_single, np.float64)),
        rtol=1e-5, atol=1e-5)

    # Batched call (non-multiple-of-8 batch exercises padding + full-vreg store).
    y_batch = jax.random.normal(jax.random.PRNGKey(0), (5, 3), jnp.float32)
    out_batch = jax.block_until_ready(lambda_rhs_batched(y_batch))
    assert out_batch.shape == (5, 3) and out_batch.dtype == jnp.float32
    np.testing.assert_allclose(
        np.asarray(out_batch),
        _ref_rhs(np.asarray(y_batch, np.float64)),
        rtol=1e-5, atol=1e-5)

    print("KERNEL_OK")
</pallas_src>

<mosaic_0001>
module attributes {stable_mosaic.version = 11 : i64} {
  func.func @lambda_kernel(%arg0: i32, %arg1: memref<8x1xf32, #tpu.memory_space<vmem>>, %arg2: memref<8x1xf32, #tpu.memory_space<vmem>>, %arg3: memref<8x1xf32, #tpu.memory_space<vmem>>, %arg4: memref<8x128xf32, #tpu.memory_space<vmem>>) attributes {dimension_semantics = [#tpu.dimension_semantics<parallel>], iteration_bounds = array<i64: 1>, scalar_prefetch = 0 : i64, scratch_operands = 0 : i64, tpu.core_type = #tpu.core_type<tc>, window_params = [{transform_indices = @transform_0, window_bounds = array<i64: 8, 1>}, {transform_indices = @transform_1, window_bounds = array<i64: 8, 1>}, {transform_indices = @transform_2, window_bounds = array<i64: 8, 1>}, {transform_indices = @transform_3, window_bounds = array<i64: 8, 128>}]} {
    %c0 = arith.constant 0 : index
    %c0_0 = arith.constant 0 : index
    %0 = vector.load %arg1[%c0, %c0_0] : memref<8x1xf32, #tpu.memory_space<vmem>>, vector<8x1xf32>
    %c0_1 = arith.constant 0 : index
    %c0_2 = arith.constant 0 : index
    %1 = vector.load %arg2[%c0_1, %c0_2] : memref<8x1xf32, #tpu.memory_space<vmem>>, vector<8x1xf32>
    %c0_3 = arith.constant 0 : index
    %c0_4 = arith.constant 0 : index
    %2 = vector.load %arg3[%c0_3, %c0_4] : memref<8x1xf32, #tpu.memory_space<vmem>>, vector<8x1xf32>
    %3 = math.sin %2 : vector<8x1xf32>
    %cst = arith.constant 1.000000e+00 : f32
    %4 = vector.broadcast %cst : f32 to vector<8x1xf32>
    %5 = arith.mulf %4, %3 : vector<8x1xf32>
    %cst_5 = arith.constant -1.11111116 : f32
    %6 = vector.broadcast %cst_5 : f32 to vector<8x1xf32>
    %7 = arith.mulf %6, %1 : vector<8x1xf32>
    %cst_6 = arith.constant -0.30864197 : f32
    %8 = vector.broadcast %cst_6 : f32 to vector<8x1xf32>
    %9 = arith.mulf %8, %3 : vector<8x1xf32>
    %10 = arith.addf %7, %9 : vector<8x1xf32>
    %11 = arith.addf %0, %1 : vector<8x1xf32>
    %cst_7 = arith.constant 0.177777782 : f32
    %12 = vector.broadcast %cst_7 : f32 to vector<8x1xf32>
    %13 = arith.mulf %12, %3 : vector<8x1xf32>
    %14 = arith.addf %11, %13 : vector<8x1xf32>
    %cst_8 = arith.constant 1.010000e+00 : f32
    %15 = vector.broadcast %cst_8 : f32 to vector<8x1xf32>
    %16 = arith.mulf %15, %14 : vector<8x1xf32>
    %cst_9 = arith.constant 2.000000e+00 : f32
    %17 = vector.broadcast %cst_9 : f32 to vector<8x1xf32>
    %18 = arith.subf %17, %16 : vector<8x1xf32>
    %19 = tpu.iota {dimensions = array<i32: 1>} : vector<8x128xi32>
    %c0_i32 = arith.constant 0 : i32
    %20 = vector.broadcast %c0_i32 : i32 to vector<8x128xi32>
    %21 = arith.cmpi eq, %19, %20 : vector<8x128xi32>
    %c1_i32 = arith.constant 1 : i32
    %22 = vector.broadcast %c1_i32 : i32 to vector<8x128xi32>
    %23 = arith.cmpi eq, %19, %22 : vector<8x128xi32>
    %c2_i32 = arith.constant 2 : i32
    %24 = vector.broadcast %c2_i32 : i32 to vector<8x128xi32>
    %25 = arith.cmpi eq, %19, %24 : vector<8x128xi32>
    %cst_10 = arith.constant 0.000000e+00 : f32
    %26 = vector.shape_cast %18 : vector<8x1xf32> to vector<8x1xf32>
    %27 = vector.broadcast %26 : vector<8x1xf32> to vector<8x128xf32>
    %28 = vector.broadcast %cst_10 : f32 to vector<8x128xf32>
    %29 = arith.select %25, %27, %28 : vector<8x128xi1>, vector<8x128xf32>
    %30 = vector.shape_cast %10 : vector<8x1xf32> to vector<8x1xf32>
    %31 = vector.broadcast %30 : vector<8x1xf32> to vector<8x128xf32>
    %32 = arith.select %23, %31, %29 : vector<8x128xi1>, vector<8x128xf32>
    %33 = vector.shape_cast %5 : vector<8x1xf32> to vector<8x1xf32>
    %34 = vector.broadcast %33 : vector<8x1xf32> to vector<8x128xf32>
    %35 = arith.select %21, %34, %32 : vector<8x128xi1>, vector<8x128xf32>
    %c0_11 = arith.constant 0 : index
    %c0_12 = arith.constant 0 : index
    %36 = vector.load %arg4[%c0_11, %c0_12] : memref<8x128xf32, #tpu.memory_space<vmem>>, vector<8x128xf32>
    tpu.vector_store %arg4[%c0_11, %c0_12], %35 {strides = array<i32>} : memref<8x128xf32, #tpu.memory_space<vmem>>, vector<8x128xf32>,
    return
  }
  func.func @transform_0(%arg0: i32) -> (i32, i32) {
    %c0_i32 = arith.constant 0 : i32
    %c0_i32_0 = arith.constant 0 : i32
    return %arg0, %c0_i32 : i32, i32
  }
  func.func @transform_1(%arg0: i32) -> (i32, i32) {
    %c0_i32 = arith.constant 0 : i32
    %c0_i32_0 = arith.constant 0 : i32
    return %arg0, %c0_i32 : i32, i32
  }
  func.func @transform_2(%arg0: i32) -> (i32, i32) {
    %c0_i32 = arith.constant 0 : i32
    %c0_i32_0 = arith.constant 0 : i32
    return %arg0, %c0_i32 : i32, i32
  }
  func.func @transform_3(%arg0: i32) -> (i32, i32) {
    %c0_i32 = arith.constant 0 : i32
    %c0_i32_0 = arith.constant 0 : i32
    return %arg0, %c0_i32 : i32, i32
  }
}

</mosaic_0001>

<bundles_post_ra>
// kernel: lambda_rhs_batched.1
= control target key start
LH: loop header
LB: loop body
LE: loop exit
PB: predicated region body
PF: predicated region fallthrough
CT: control target
= control target key end

     0   :  { %v178_v0 = vmov 0   ;;  %v179_v13 = vmov 683565275   ;;  %v180_v15 = vmov 2475754826   ;;  %s238_s2 = inlined_call_operand.vmem [shape: f32[8,1], index: 2, kind: input, shape index: {}]   ;;  %s239_s0 = inlined_call_operand.vmem [shape: f32[8,1], index: 0, kind: input, shape index: {}]   ;;  %s240_s1 = inlined_call_operand.vmem [shape: f32[8,1], index: 1, kind: input, shape index: {}]   ;;  %s241_s3 = inlined_call_operand.vmem [shape: f32[8,128], index: 3, kind: output, shape index: {}]  }
   0x1   :  { %172 = vset.pattern.permute.xlu0 %v178_v0  ;;  %v208_v1 = vld [vmem:[%s238_s2] sm:$0xff]  ;;  %173 = vset.pattern.permute.xlu1 %v178_v0  ;;  %v181_v17 = vmov 2131351028   ;;  %v182_v19 = vmov 2102212464  }
   0x2   :  { %v20_v2 = vand.u32 2139095040, %v208_v1  ;;  %v17_v4 = vand.u32 2147483647, %v208_v1  ;;  %v183_v21 = vmov 920167782   ;;  %vm19_vm7 = vcmp.lt.s32.totalorder %v208_v1, 0 }
   0x3   :  { %v184_v28 = vmov 1326507024   ;;  %vm109_vm12 = vweird.f32 %v208_v1 }
   0x4   :  { %v21_v3 = vshrl.u32 %v20_v2, 23  ;;  %v24_v7 = vand.u32 8388607, %v17_v4  ;;  %vm18_vm8 = vcmp.le.f32.partialorder %v17_v4, 0.7853982  ;;  %v15_v4 = vld [vmem:[%s240_s1] sm:$0xff] }
   0x6   :  { %v157_v5 = vadd.s32 4294967169, %v21_v3  ;;  %v25_v10 = vor.u32 8388608, %v24_v7 }
   0x8   :  { %v27_v6 = vadd.s32 1, %v157_v5  ;;  %v65_v30 = vshll.u32 %v25_v10, 8 }
   0xa   :  { %vm28_vm0 = vcmp.gt.s32.totalorder %v27_v6, 0 }
   0xb   :  { %v29_v8 = vsel %vm28_vm0, %v27_v6, 0 }
   0xc   :  { %v31_v9 = vand.u32 31, %v29_v8  ;;  %v30_v11 = vshrl.u32 %v29_v8, 5 }
   0xe   :  { %v32_v12 = vsub.s32 32, %v31_v9  ;;  %v34_v14 = vshll.u32 %v179_v13, %v31_v9  ;;  %v37_v16 = vshll.u32 %v180_v15, %v31_v9  ;;  %v40_v18 = vshll.u32 %v181_v17, %v31_v9 }
   0xf   :  { %v43_v20 = vshll.u32 %v182_v19, %v31_v9  ;;  %v46_v22 = vshll.u32 %v183_v21, %v31_v9  ;;  %vm49_vm1 = vcmp.lt.s32.totalorder %v30_v11, 1  ;;  %vm52_vm2 = vcmp.lt.s32.totalorder %v30_v11, 4 }
  0x10   :  { %v33_v23 = vshrl.u32 %v179_v13, %v32_v12  ;;  %v35_v24 = vshrl.u32 %v180_v15, %v32_v12  ;;  %v38_v25 = vshrl.u32 %v181_v17, %v32_v12  ;;  %v41_v26 = vshrl.u32 %v182_v19, %v32_v12 }
  0x11   :  { %v44_v27 = vshrl.u32 %v183_v21, %v32_v12  ;;  %v47_v29 = vshrl.u32 %v184_v28, %v32_v12  ;;  %vm50_vm3 = vcmp.lt.s32.totalorder %v30_v11, 2  ;;  %vm51_vm4 = vcmp.lt.s32.totalorder %v30_v11, 3 }
  0x12   :  { %v36_v31 = vor.u32 %v35_v24, %v34_v14  ;;  %v39_v32 = vor.u32 %v38_v25, %v37_v16  ;;  %v42_v33 = vor.u32 %v41_v26, %v40_v18  ;;  %v14_v26 = vld [vmem:[%s239_s0] sm:$0xff] }
  0x13   :  { %v45_v34 = vor.u32 %v44_v27, %v43_v20  ;;  %v48_v35 = vor.u32 %v47_v29, %v46_v22 }
  0x14   :  { %v53_v36 = vsel %vm49_vm1, %v33_v23, %v36_v31  ;;  %v54_v37 = vsel %vm52_vm2, %v42_v33, 2102212464  ;;  %v57_v38 = vsel %vm49_vm1, %v36_v31, %v39_v32  ;;  %v61_v39 = vsel %vm49_vm1, %v39_v32, %v42_v33 }
  0x15   :  { %v55_v40 = vsel %vm51_vm4, %v39_v32, %v54_v37  ;;  %v58_v41 = vsel %vm52_vm2, %v45_v34, 920167782  ;;  %v62_v42 = vsel %vm52_vm2, %v48_v35, 1326507024  ;;  %v124_v31 = vadd.f32 %v15_v4, %v14_v26 }
  0x16   :  { %v59_v43 = vsel %vm51_vm4, %v42_v33, %v58_v41  ;;  %v63_v44 = vsel %vm51_vm4, %v45_v34, %v62_v42  ;;  %v56_v45 = vsel %vm50_vm3, %v53_v36, %v55_v40  ;;  %v121_v36 = vmul.f32 -1.1111112, %v15_v4 }
  0x17   :  { %v60_v46 = vsel %vm50_vm3, %v57_v38, %v59_v43  ;;  %v64_v47 = vsel %vm50_vm3, %v61_v39, %v63_v44  ;;  %v72_v52 = vmul.u32 %v65_v30, %v56_v45  ;;  %v129_v40 = vlaneseq }
  0x18   :  { %v214_v48 = vmul.u32.u64.low %v65_v30, %v64_v47  ;;  %v215_v49 = vmul.u32.u64.high %v65_v30, %v64_v47, %v214_v48  ;;  %v217_v50 = vmul.u32.u64.low %v65_v30, %v60_v46  ;;  %v218_v51 = vmul.u32.u64.high %v65_v30, %v60_v46, %v217_v50 }
  0x19   :  { %v130_v41 = vand.u32 127, %v129_v40 }
  0x1a   :  { %vm74_vm5 = vc.u32 %v215_v49, %v217_v50  ;;  %v75_v53 = vadd.s32 1, %v218_v51  ;;  %v73_v0 = vadd.s32 %v217_v50, %v215_v49 }
  0x1b   :  { %vm133_vm13 = vcmp.eq.s32.totalorder %v130_v41, 2  ;;  %vm132_vm14 = vcmp.eq.s32.totalorder %v130_v41, 1  ;;  %vm131_vm15 = vcmp.eq.s32.totalorder %v130_v41, 0 }
  0x1c   :  { %v76_v54 = vsel %vm74_vm5, %v75_v53, %v218_v51 }
  0x1d   :  { %v77_v55 = vadd.s32 %v76_v54, %v72_v52 }
  0x1f   :  { %v78_v56 = vadd.s32 536870912, %v77_v55 }
  0x21   :  { %v79_v57 = vshrl.u32 %v78_v56, 30 }
  0x23   :  { %v80_v58 = vshll.u32 %v79_v57, 30  ;;  %v103_v15 = vsub.s32 4, %v79_v57 }
  0x25   :  { %v81_v59 = vsub.s32 %v77_v55, %v80_v58  ;;  %v104_v18 = vsel %vm19_vm7, %v103_v15, %v79_v57 }
  0x26   :  { %v106_v20 = vsel %vm18_vm8, 0, %v104_v18 }
  0x27   :  { %v83_v60 = vsub.s32 0, %v81_v59  ;;  %v110_v21 = vadd.s32 3, %v106_v20 }
  0x29   :  { %v158_v61 = vmin.u32 %v83_v60, %v81_v59  ;;  %v111_v22 = vand.u32 3, %v110_v21 }
  0x2b   :  { %v85_v62 = vclz %v158_v61  ;;  %vm116_vm9 = vcmp.eq.s32.totalorder %v111_v22, 2  ;;  %vm113_vm10 = vcmp.eq.s32.totalorder %v111_v22, 0  ;;  %vm112_vm11 = vcmp.lt.s32.totalorder %v111_v22, 2 }
  0x2d   :  { %v159_v63 = vadd.s32 4294967294, %v85_v62 }
  0x2f   :  { %vm160_vm6 = vcmp.lt.s32.totalorder %v159_v63, 0 }
  0x30   :  { %v88_v2 = vsel %vm160_vm6, 0, %v159_v63 }
  0x31   :  { %v89_v3 = vsub.s32 32, %v88_v2  ;;  %v90_v5 = vshll.u32 %v81_v59, %v88_v2  ;;  %v93_v6 = vsub.s32 4294967266, %v88_v2 }
  0x33   :  { %v91_v7 = vshrl.u32 %v73_v0, %v89_v3  ;;  %v94_v8 = vadd.s32 127, %v93_v6 }
  0x35   :  { %v92_v9 = vor.u32 %v91_v7, %v90_v5  ;;  %v95_v10 = vshll.u32 %v94_v8, 23 }
  0x37   :  { %v96_v11 = vor.u32 4788187, %v95_v10  ;;  %v99_v12 = vcvt.s32.f32 %v92_v9 }
  0x39   :  { %v97_v13 = vand.u32 2147483647, %v96_v11 }
  0x3b   :  { %v100_v14 = vmul.f32 %v99_v12, %v97_v13 }
  0x3d   :  { %v101_v16 = vxor.u32 2147483648, %v100_v14 }
  0x3f   :  { %v102_v17 = vsel %vm19_vm7, %v101_v16, %v100_v14 }
  0x40   :  { %v105_v19 = vsel %vm18_vm8, %v208_v1, %v102_v17 }
  0x41   :  { %174 = vcosq.f32 %v105_v19 }
  0x42   :  { %176 = vsinq.f32 %v105_v19 }
  0x4e   :  { %v175_v23 = vpop.eup %174 }
  0x4f   :  { %v177_v24 = vpop.eup %176  ;;  %v117_v25 = vxor.u32 2147483648, %v175_v23 }
  0x50   :  { %v114_v27 = vxor.u32 2147483648, %v177_v24 }
  0x51   :  { %v118_v28 = vsel %vm116_vm9, %v117_v25, %v177_v24 }
  0x52   :  { %v115_v29 = vsel %vm113_vm10, %v175_v23, %v114_v27 }
  0x53   :  { %v119_v30 = vsel %vm112_vm11, %v115_v29, %v118_v28 }
  0x54   :  { %v120_v32 = vsel %vm109_vm12, nan, %v119_v30 }
  0x55   :  { %v125_v33 = vmul.f32 0.17777778, %v120_v32  ;;  %148 = vperm.xlu1 %173, %v120_v32   ;;  %v122_v37 = vmul.f32 -0.30864197, %v120_v32 }
  0x57   :  { %v126_v34 = vadd.f32 %v125_v33, %v124_v31  ;;  %v123_v39 = vadd.f32 %v122_v37, %v121_v36 }
  0x59   :  { %v127_v35 = vmul.f32 1.01, %v126_v34 }
  0x5b   :  { %v128_v38 = vsub.f32 2.0, %v127_v35 }
  0x5d   :  { %136 = vperm.xlu0 %172, %v128_v38  }
  0x61   :  { %142 = vperm.xlu0 %172, %v123_v39  }
  0xd0   :  { %v149_v1 = vpop.permute.xlu1 %148 }
  0xd8   :  { %v137_v42 = vpop.permute.xlu0 %136 }
  0xd9   :  { %v139_v43 = vsel %vm133_vm13, %v137_v42, 0.0 }
  0xdc   :  { %v143_v44 = vpop.permute.xlu0 %142 }
  0xdd   :  { %v145_v45 = vsel %vm132_vm14, %v143_v44, %v139_v43 }
  0xde   :  { %v151_v46 = vsel %vm131_vm15, %v149_v1, %v145_v45 }
  0xdf   :  { %152 = vst [vmem:[%s241_s3] sm:$0xff] %v151_v46 }

</bundles_post_ra>
